<compile_context>
chip_gen: v5e
topology: v5e:2x2
jax: 0.10.0
libtpu: 0.0.40
codegen_flags: <defaults>
</compile_context>

<pallas_src>
import functools
import math

import jax
import jax.numpy as jnp
from jax.experimental import pallas as pl
from jax.experimental.pallas import tpu as pltpu


# Per-input-block byte budget.  Double-buffered inputs (~8 MiB) plus the small
# output buffers fit the default scoped-VMEM limit on all of v5e/v6e/v7x.
_BLOCK_BYTE_BUDGET = 4 * 1024 * 1024


def _round_up(a: int, b: int) -> int:
    return ((a + b - 1) // b) * b


def _min_rows(itemsize: int) -> int:
    # Native sublane tiling: 8 rows for 4-byte, 16 for 2-byte, 32 for 1-byte.
    return max(8, 32 // itemsize)


def _pick_row_tile(m: int, padded_w: int, itemsize: int) -> int:
    """Largest row tile (multiple of the native sublane tile) within budget."""
    min_rows = _min_rows(itemsize)
    rows = _BLOCK_BYTE_BUDGET // (padded_w * itemsize)
    rows = max(min_rows, (rows // min_rows) * min_rows)
    rows = min(rows, _round_up(m, min_rows))
    # Prefer >= 2 grid steps so the "parallel" axis can be split across the
    # two v7x TensorCores, unless the whole input is tiny anyway.
    if rows >= m and m > 2 * min_rows and m * padded_w * itemsize > (512 << 10):
        rows = max(min_rows, _round_up(pl.cdiv(m, 2), min_rows))
    return rows


# --------------------------------------------------------------------------
# Kernels
# --------------------------------------------------------------------------
def _mean_rows_kernel(x_ref, o_ref, *, inv_w):
    # Reduce over the lane axis; the upcast is fused into the reduction so no
    # full f32 copy of the (possibly bf16) block is materialized.
    s = jnp.sum(x_ref[...], axis=-1, keepdims=True, dtype=jnp.float32)
    o_ref[...] = (s * inv_w).astype(o_ref.dtype)


def _mean_groups_kernel(x_ref, o_ref, *, group_w, inv_w):
    # Block is (tile_r, 128) with n_groups = 128 // group_w original rows of
    # width group_w folded into each 128-lane row.  Per-group sums are formed
    # with a small MXU matmul against a 0/1 group-indicator matrix, which
    # keeps the reduction off the VPU and avoids lane-splitting reshapes.
    x = x_ref[...]
    wf = x.shape[-1]
    n_groups = wf // group_w
    col = jax.lax.broadcasted_iota(jnp.int32, (wf, n_groups), 0)
    grp = jax.lax.broadcasted_iota(jnp.int32, (wf, n_groups), 1)
    gmat = jnp.logical_and(col >= grp * group_w,
                           col < (grp + 1) * group_w).astype(x.dtype)
    if x.dtype == jnp.float32:
        s = jnp.dot(x, gmat, preferred_element_type=jnp.float32,
                    precision=jax.lax.Precision.HIGHEST)
    else:
        s = jnp.dot(x, gmat, preferred_element_type=jnp.float32)
    o_ref[...] = (s * inv_w).astype(o_ref.dtype)


def _mean_rows_split_kernel(x_ref, o_ref, acc_ref, *, w_total, block_w, inv_w):
    # Grid = (rows, W-chunks); W-chunk axis is last / "arbitrary" and the
    # output block index is constant along it, so acc_ref is a resident
    # accumulator for the current row tile.
    k = pl.program_id(1)

    @pl.when(k == 0)
    def _init():
        acc_ref[...] = jnp.zeros_like(acc_ref)

    x = x_ref[...]
    if w_total % block_w != 0:
        # Mask the padded columns of the ragged last W-chunk.
        col = jax.lax.broadcasted_iota(jnp.int32, x.shape, 1) + k * block_w
        x = jnp.where(col < w_total, x, jnp.zeros_like(x))
    acc_ref[...] += jnp.sum(x, axis=-1, keepdims=True, dtype=jnp.float32)

    @pl.when(k == pl.num_programs(1) - 1)
    def _finalize():
        o_ref[...] = (acc_ref[...] * inv_w).astype(o_ref.dtype)


# --------------------------------------------------------------------------
# Wrapper
# --------------------------------------------------------------------------
def my_avg_pool(x: jax.Array) -> jax.Array:
    """Equivalent of torch `x.mean(dim=-1)` for floating inputs of rank >= 1."""
    if x.ndim == 0:
        raise ValueError("my_avg_pool: input must have at least 1 dimension")
    if not jnp.issubdtype(x.dtype, jnp.floating):
        # torch.mean raises for integer tensors; mirror that instead of
        # silently truncating an f32 mean back to an integer dtype.
        raise TypeError("my_avg_pool: only floating dtypes are supported")

    lead = x.shape[:-1]
    w = x.shape[-1]
    m = math.prod(lead) if lead else 1
    itemsize = jnp.dtype(x.dtype).itemsize
    min_rows = _min_rows(itemsize)
    inv_w = 1.0 / w

    x2d = x.reshape(m, w)

    # ---- Path 1: small W that divides the 128-lane width -> fold rows so
    #      loads are fully lane-dense (the example NCHW case, W = 16).
    fold = (128 // w) if (w < 128 and 128 % w == 0) else 1
    if fold > 1 and m % fold == 0:
        mf = m // fold
        xf = x2d.reshape(mf, 128)          # contiguous -> free reshape
        tile_r = _pick_row_tile(mf, 128, itemsize)
        kernel = functools.partial(_mean_groups_kernel, group_w=w, inv_w=inv_w)
        out = pl.pallas_call(
            kernel,
            out_shape=jax.ShapeDtypeStruct((mf, fold), x.dtype),
            grid=(pl.cdiv(mf, tile_r),),
            in_specs=[pl.BlockSpec((tile_r, 128), lambda i: (i, 0))],
            out_specs=pl.BlockSpec((tile_r, fold), lambda i: (i, 0)),
            compiler_params=pltpu.CompilerParams(
                dimension_semantics=("parallel",)),
        )(xf)
        return out.reshape(lead)

    padded_w = _round_up(w, 128)

    # ---- Path 2: a full row (padded to 128 lanes) fits the block budget ->
    #      single "parallel" grid axis over rows.
    if padded_w * itemsize * min_rows <= _BLOCK_BYTE_BUDGET:
        tile_m = _pick_row_tile(m, padded_w, itemsize)
        kernel = functools.partial(_mean_rows_kernel, inv_w=inv_w)
        out = pl.pallas_call(
            kernel,
            out_shape=jax.ShapeDtypeStruct((m, 1), x.dtype),
            grid=(pl.cdiv(m, tile_m),),
            in_specs=[pl.BlockSpec((tile_m, w), lambda i: (i, 0))],
            out_specs=pl.BlockSpec((tile_m, 1), lambda i: (i, 0)),
            compiler_params=pltpu.CompilerParams(
                dimension_semantics=("parallel",)),
        )(x2d)
        return out.reshape(lead)

    # ---- Path 3: huge W -> tile the reduction axis ("arbitrary", innermost)
    #      and accumulate partial sums in a VMEM f32 scratch.
    tile_m = min_rows
    block_w = max(128, (_BLOCK_BYTE_BUDGET // (tile_m * itemsize) // 128) * 128)
    kernel = functools.partial(_mean_rows_split_kernel,
                               w_total=w, block_w=block_w, inv_w=inv_w)
    out = pl.pallas_call(
        kernel,
        out_shape=jax.ShapeDtypeStruct((m, 1), x.dtype),
        grid=(pl.cdiv(m, tile_m), pl.cdiv(w, block_w)),
        in_specs=[pl.BlockSpec((tile_m, block_w), lambda i, k: (i, k))],
        out_specs=pl.BlockSpec((tile_m, 1), lambda i, k: (i, 0)),
        scratch_shapes=[pltpu.VMEM((tile_m, 1), jnp.float32)],
        compiler_params=pltpu.CompilerParams(
            dimension_semantics=("parallel", "arbitrary")),
    )(x2d)
    return out.reshape(lead)


if __name__ == "__main__":
    key = jax.random.PRNGKey(0)
    k1, k2, k3 = jax.random.split(key, 3)

    # NCHW-style input matching the module's typical use: (B, C, H, W).
    x = jax.random.normal(k1, (2, 4, 16, 16), dtype=jnp.float32)
    out = jax.block_until_ready(my_avg_pool(x))
    ref = jnp.mean(x, axis=-1)
    assert out.shape == ref.shape, (out.shape, ref.shape)
    # Fold path goes through the MXU's multi-pass f32 matmul.
    assert jnp.allclose(out, ref, atol=1e-4, rtol=1e-4)

    # Ragged row count + W >= 128 (plain path).
    x2 = jax.random.normal(k2, (3, 5, 200), dtype=jnp.float32)
    out2 = jax.block_until_ready(my_avg_pool(x2))
    ref2 = jnp.mean(x2, axis=-1)
    assert out2.shape == ref2.shape
    assert jnp.allclose(out2, ref2, atol=1e-5, rtol=1e-5)

    # bf16 input (f32 accumulation inside the kernel).
    x3 = jax.random.normal(k3, (4, 8, 256), dtype=jnp.bfloat16)
    out3 = jax.block_until_ready(my_avg_pool(x3))
    ref3 = jnp.mean(x3.astype(jnp.float32), axis=-1)
    assert out3.shape == ref3.shape
    assert jnp.allclose(out3.astype(jnp.float32), ref3, atol=1e-2, rtol=1e-2)

    print("KERNEL_OK")
</pallas_src>

<mosaic_0001>
module attributes {stable_mosaic.version = 11 : i64} {
  func.func @_mean_groups_kernel(%arg0: i32, %arg1: memref<16x128xf32, #tpu.memory_space<vmem>>, %arg2: memref<16x8xf32, #tpu.memory_space<vmem>>) attributes {dimension_semantics = [#tpu.dimension_semantics<parallel>], iteration_bounds = array<i64: 1>, scalar_prefetch = 0 : i64, scratch_operands = 0 : i64, tpu.core_type = #tpu.core_type<tc>, window_params = [{transform_indices = @transform_0, window_bounds = array<i64: 16, 128>}, {transform_indices = @transform_1, window_bounds = array<i64: 16, 8>}]} {
    %c0 = arith.constant 0 : index
    %c0_0 = arith.constant 0 : index
    %0 = vector.load %arg1[%c0, %c0_0] : memref<16x128xf32, #tpu.memory_space<vmem>>, vector<16x128xf32>
    %1 = tpu.iota {dimensions = array<i32: 0>} : vector<128x8xi32>
    %2 = tpu.iota {dimensions = array<i32: 1>} : vector<128x8xi32>
    %c16_i32 = arith.constant 16 : i32
    %3 = vector.broadcast %c16_i32 : i32 to vector<128x8xi32>
    %4 = arith.muli %2, %3 : vector<128x8xi32>
    %5 = arith.cmpi sge, %1, %4 : vector<128x8xi32>
    %c1_i32 = arith.constant 1 : i32
    %6 = vector.broadcast %c1_i32 : i32 to vector<128x8xi32>
    %7 = arith.addi %2, %6 : vector<128x8xi32>
    %c16_i32_1 = arith.constant 16 : i32
    %8 = vector.broadcast %c16_i32_1 : i32 to vector<128x8xi32>
    %9 = arith.muli %7, %8 : vector<128x8xi32>
    %10 = arith.cmpi slt, %1, %9 : vector<128x8xi32>
    %11 = arith.andi %5, %10 : vector<128x8xi1>
    %12 = arith.extui %11 : vector<128x8xi1> to vector<128x8xi32>
    %13 = arith.sitofp %12 : vector<128x8xi32> to vector<128x8xf32>
    %cst = arith.constant dense<0.000000e+00> : vector<16x8xf32>
    %14 = tpu.matmul %0, %13, %cst {dimension_numbers = #tpu.dot_dimension_numbers<[1], [0], [0], [1], [0, 0, 1, 1], [], []>, precision = #tpu.contract_precision<fp32>} : vector<16x128xf32>, vector<128x8xf32>, vector<16x8xf32> -> vector<16x8xf32>
    %cst_2 = arith.constant 6.250000e-02 : f32
    %15 = vector.broadcast %cst_2 : f32 to vector<16x8xf32>
    %16 = arith.mulf %14, %15 : vector<16x8xf32>
    %c0_3 = arith.constant 0 : index
    %c0_4 = arith.constant 0 : index
    %17 = vector.load %arg2[%c0_3, %c0_4] : memref<16x8xf32, #tpu.memory_space<vmem>>, vector<16x8xf32>
    tpu.vector_store %arg2[%c0_3, %c0_4], %16 {strides = array<i32>} : memref<16x8xf32, #tpu.memory_space<vmem>>, vector<16x8xf32>,
    return
  }
  func.func @transform_0(%arg0: i32) -> (i32, i32) {
    %c0_i32 = arith.constant 0 : i32
    %c0_i32_0 = arith.constant 0 : i32
    return %arg0, %c0_i32 : i32, i32
  }
  func.func @transform_1(%arg0: i32) -> (i32, i32) {
    %c0_i32 = arith.constant 0 : i32
    %c0_i32_0 = arith.constant 0 : i32
    return %arg0, %c0_i32 : i32, i32
  }
}

</mosaic_0001>

<bundles_post_ra>
// kernel: tpu_custom_call.1
= control target key start
LH: loop header
LB: loop body
LE: loop exit
PB: predicated region body
PF: predicated region fallthrough
CT: control target
= control target key end

     0   :  { %6 = vsyncpa [#allocation3], 0  ;;  %s637_s9 = smov [#allocation2]   ;;  %s638_s11 = smov 128   ;;  %v26_v0 = vlaneseq  ;;  %s1158_s0 = inlined_call_operand.hbm [shape: f32[16,128], index: 0, kind: input, shape index: {}]   ;;  %s1159_s1 = inlined_call_operand.vmem [shape: f32[16,8], index: 1, kind: output, shape index: {}]  }
   0x1   :  { %s11_s8 = sshll.u32 %s1158_s0, 4  ;;  %s13_s10 = sshll.u32 %s637_s9, 4  ;;  %s12_s8 = int_to_ptr.hbm [resolvable:$true] %s11_s8  ;;  %s14_s10 = int_to_ptr.vmem [resolvable:$true] %s13_s10 }
   0x2   :  { %s639_s12 = smov 8  }
   0x3   :  { %19 = dma.hbm_to_vmem [thread:$0]  %s12_s8, 256, %s14_s10, [#allocation3], %s638_s11, %s638_s11, %s639_s12  }
   0x4   :  { %635 = dma.done.wait [#allocation3], 256  }
   0x5   :  { %636 = vsyncadd [#allocation3], 4294967040  ;;  %v655_v1 = vshrl.u32 %v26_v0, 7  ;;  %v44_v2 = vand.u32 127, %v26_v0  ;;  %v640_v14 = vmov 1.0   ;;  %v641_v16 = vmov 0.0  }
   0x6   :  { %v1178_v44 = vmov 0  ;;  %v1180_v50 = vmov 0 }
   0x7   :  { %v42_v3 = vadd.s32 120, %v655_v1  ;;  %v658_v4 = vmul.u32 16, %v44_v2  ;;  %v62_v5 = vadd.s32 1, %v44_v2  ;;  %v41_v6 = vadd.s32 112, %v655_v1 }
   0x8   :  { %v40_v7 = vadd.s32 104, %v655_v1  ;;  %v39_v8 = vadd.s32 96, %v655_v1  ;;  %v38_v9 = vadd.s32 88, %v655_v1  ;;  %v37_v10 = vadd.s32 80, %v655_v1 }
   0x9   :  { %vm61_vm0 = vcmp.ge.s32.totalorder %v42_v3, %v658_v4  ;;  %v666_v11 = vmul.u32 16, %v62_v5  ;;  %vm60_vm1 = vcmp.ge.s32.totalorder %v41_v6, %v658_v4  ;;  %v36_v12 = vadd.s32 72, %v655_v1 }
   0xa   :  { %vm59_vm2 = vcmp.ge.s32.totalorder %v40_v7, %v658_v4  ;;  %vm58_vm3 = vcmp.ge.s32.totalorder %v39_v8, %v658_v4  ;;  %vm57_vm4 = vcmp.ge.s32.totalorder %v38_v9, %v658_v4  ;;  %vm56_vm5 = vcmp.ge.s32.totalorder %v37_v10, %v658_v4 }
   0xb   :  { %vm79_vm6 = vcmp.lt.s32.totalorder %v42_v3, %v666_v11  ;;  %vm78_vm7 = vcmp.lt.s32.totalorder %v41_v6, %v666_v11  ;;  %vm77_vm8 = vcmp.lt.s32.totalorder %v40_v7, %v666_v11  ;;  %vm76_vm9 = vcmp.lt.s32.totalorder %v39_v8, %v666_v11 }
   0xc   :  { %vm678_vm10 = vmand %vm61_vm0, %vm79_vm6  ;;  %vm75_vm11 = vcmp.lt.s32.totalorder %v38_v9, %v666_v11  ;;  %vm74_vm12 = vcmp.lt.s32.totalorder %v37_v10, %v666_v11  ;;  %vm55_vm13 = vcmp.ge.s32.totalorder %v36_v12, %v658_v4  ;;  %vm73_vm14 = vcmp.lt.s32.totalorder %v36_v12, %v666_v11 }
   0xd   :  { %526 = vmatpush.msk.msra.mxu0 %vm678_vm10, %v640_v14  ;;  %vm691_vm15 = vmand %vm60_vm1, %vm78_vm7  ;;  %v525_v17 = vsel %vm678_vm10, 1.0, %v641_v16  ;;  %542 = vmatpush.msk.msra.mxu3 %vm678_vm10, %v640_v14  ;;  %v35_v18 = vadd.s32 64, %v655_v1  ;;  %v34_v19 = vadd.s32 56, %v655_v1  ;;  %v33_v20 = vadd.s32 48, %v655_v1 }
   0xe   :  { %v178_v21 = vsub.f32 %v525_v17, %v525_v17  ;;  %vm708_vm0 = vmand %vm59_vm2, %vm77_vm8  ;;  %v524_v23 = vsel %vm691_vm15, 1.0, %v641_v16  ;;  %v716_v24 = vadd.s32 40, %v655_v1  ;;  %v719_v25 = vadd.s32 32, %v655_v1 }
   0xf   :  { %527 = vmatpush.msk.msra.mxu0 %vm691_vm15, %v640_v14  ;;  %v184_v26 = vsub.f32 %v524_v23, %v524_v23  ;;  %vm728_vm1 = vmand %vm58_vm3, %vm76_vm9  ;;  %v523_v28 = vsel %vm708_vm0, 1.0, %v641_v16  ;;  %543 = vmatpush.msk.msra.mxu3 %vm691_vm15, %v640_v14  ;;  %vm54_vm2 = vcmp.ge.s32.totalorder %v35_v18, %v658_v4  ;;  %vm72_vm6 = vcmp.lt.s32.totalorder %v35_v18, %v666_v11 }
  0x10   :  { %284 = vmatpush.msra.mxu2 %v178_v21  ;;  %v190_v29 = vsub.f32 %v523_v28, %v523_v28  ;;  %vm744_vm3 = vmand %vm57_vm4, %vm75_vm11  ;;  %v748_v31 = vand.u32 4294901760, %v178_v21  ;;  %v522_v32 = vsel %vm728_vm1, 1.0, %v641_v16  ;;  %vm53_vm7 = vcmp.ge.s32.totalorder %v34_v19, %v658_v4 }
  0x11   :  { %528 = vmatpush.msk.msra.mxu0 %vm708_vm0, %v640_v14  ;;  %v196_v33 = vsub.f32 %v522_v32, %v522_v32  ;;  %544 = vmatpush.msk.msra.mxu3 %vm708_vm0, %v640_v14  ;;  %vm764_vm4 = vmand %vm56_vm5, %vm74_vm12  ;;  %v768_v35 = vand.u32 4294901760, %v184_v26  ;;  %v521_v36 = vsel %vm744_vm3, 1.0, %v641_v16  ;;  %vm71_vm8 = vcmp.lt.s32.totalorder %v34_v19, %v666_v11 }
  0x12   :  { %287 = vmatpush.msra.mxu2 %v184_v26  ;;  %v180_v37 = vsub.f32 %v178_v21, %v748_v31  ;;  %v202_v38 = vsub.f32 %v521_v36, %v521_v36  ;;  %vm779_vm5 = vmand %vm55_vm13, %vm73_vm14  ;;  %v783_v40 = vand.u32 4294901760, %v190_v29  ;;  %v520_v41 = vsel %vm764_vm4, 1.0, %v641_v16 }
  0x13   :  { %529 = vmatpush.msk.msra.mxu0 %vm728_vm1, %v640_v14  ;;  %v186_v42 = vsub.f32 %v184_v26, %v768_v35  ;;  %545 = vmatpush.msk.msra.mxu3 %vm728_vm1, %v640_v14  ;;  %v208_v43 = vsub.f32 %v520_v41, %v520_v41  ;;  %vm799_vm9 = vmand %vm54_vm2, %vm72_vm6  ;;  %v803_v45 = vand.u32 4294901760, %v196_v33  ;;  %v519_v46 = vsel %vm779_vm5, 1.0, %v641_v16 }
  0x14   :  { %v1179_v44 = vsel %vm799_vm9, 4294967295, %v1178_v44  ;;  %290 = vmatpush.msra.mxu2 %v190_v29  ;;  %v181_v47 = vand.u32 4294901760, %v180_v37  ;;  %v192_v48 = vsub.f32 %v190_v29, %v783_v40  ;;  %v214_v49 = vsub.f32 %v519_v46, %v519_v46  ;;  %vm813_vm11 = vmand %vm53_vm7, %vm71_vm8 }
  0x15   :  { %v1181_v50 = vsel %vm813_vm11, 4294967295, %v1180_v50  ;;  %v817_v51 = vand.u32 4294901760, %v202_v38  ;;  %530 = vmatpush.msk.msra.mxu0 %vm744_vm3, %v640_v14  ;;  %v187_v52 = vand.u32 4294901760, %v186_v42  ;;  %546 = vmatpush.msk.msra.mxu3 %vm744_vm3, %v640_v14  ;;  %v198_v53 = vsub.f32 %v196_v33, %v803_v45 }
  0x16   :  { %v518_v54 = vsel %vm799_vm9, 1.0, %v641_v16  ;;  %vm52_vm12 = vcmp.ge.s32.totalorder %v33_v20, %v658_v4  ;;  %182 = vmatpush.msra.mxu1 %v181_v47  ;;  %293 = vmatpush.msra.mxu2 %v196_v33  ;;  %v193_v55 = vand.u32 4294901760, %v192_v48  ;;  %vm70_vm13 = vcmp.lt.s32.totalorder %v33_v20, %v666_v11  ;;  %v24_v48 = vld [vmem:[#allocation2] sm:$0xff] }
  0x17   :  { %v204_v56 = vsub.f32 %v202_v38, %v817_v51  ;;  %v220_v57 = vsub.f32 %v518_v54, %v518_v54  ;;  %531 = vmatpush.msk.msra.mxu0 %vm764_vm4, %v640_v14  ;;  %v199_v58 = vand.u32 4294901760, %v198_v53  ;;  %547 = vmatpush.msk.msra.mxu3 %vm764_vm4, %v640_v14  ;;  %vm838_vm14 = vmand %vm52_vm12, %vm70_vm13  ;;  %v842_v60 = vand.u32 4294901760, %v208_v43 }
  0x18   :  { %v517_v61 = vsel %vm813_vm11, 1.0, %v641_v16  ;;  %vm51_vm2 = vcmp.ge.s32.totalorder %v716_v24, %v658_v4  ;;  %188 = vmatpush.msra.mxu1 %v187_v52  ;;  %296 = vmatpush.msra.mxu2 %v202_v38  ;;  %vm69_vm6 = vcmp.lt.s32.totalorder %v716_v24, %v666_v11  ;;  %v851_v0 = vand.u32 4294901760, %v214_v49 }
  0x19   :  { %v205_v62 = vand.u32 4294901760, %v204_v56  ;;  %v226_v63 = vsub.f32 %v517_v61, %v517_v61  ;;  %532 = vmatpush.msk.msra.mxu0 %vm779_vm5, %v640_v14  ;;  %548 = vmatpush.msk.msra.mxu3 %vm779_vm5, %v640_v14  ;;  %v210_v2 = vsub.f32 %v208_v43, %v842_v60  ;;  %vm860_vm7 = vmand %vm51_vm2, %vm69_vm6  ;;  %v516_v5 = vsel %vm838_vm14, 1.0, %v641_v16 }
  0x1a   :  { %vm50_vm8 = vcmp.ge.s32.totalorder %v719_v25, %v658_v4  ;;  %vm68_vm12 = vcmp.lt.s32.totalorder %v719_v25, %v666_v11  ;;  %194 = vmatpush.msra.mxu1 %v193_v55  ;;  %299 = vmatpush.msra.mxu2 %v208_v43  ;;  %v216_v6 = vsub.f32 %v214_v49, %v851_v0  ;;  %v876_v9 = vand.u32 4294901760, %v220_v57 }
  0x1b   :  { %v232_v7 = vsub.f32 %v516_v5, %v516_v5  ;;  %vm872_vm13 = vmand %vm50_vm8, %vm68_vm12  ;;  %v515_v10 = vsel %vm860_vm7, 1.0, %v641_v16  ;;  %533 = vmatpush.msk.msra.mxu0 %vm799_vm9, %v640_v14  ;;  %v211_v12 = vand.u32 4294901760, %v210_v2  ;;  %549 = vmatpush.msk.msra.mxu3 %vm799_vm9, %v640_v14  ;;  %v30_v17 = vadd.s32 24, %v655_v1 }
  0x1c   :  { %v888_v18 = vand.u32 4294901760, %v226_v63  ;;  %200 = vmatpush.msra.mxu1 %v199_v58  ;;  %302 = vmatpush.msra.mxu2 %v214_v49  ;;  %v222_v19 = vsub.f32 %v220_v57, %v876_v9  ;;  %v238_v20 = vsub.f32 %v515_v10, %v515_v10  ;;  %v514_v21 = vsel %vm872_vm13, 1.0, %v641_v16 }
  0x1d   :  { %v29_v23 = vadd.s32 16, %v655_v1  ;;  %534 = vmatpush.msk.msra.mxu0 %vm813_vm11, %v640_v14  ;;  %550 = vmatpush.msk.msra.mxu3 %vm813_vm11, %v640_v14  ;;  %vm49_vm2 = vcmp.ge.s32.totalorder %v30_v17, %v658_v4  ;;  %vm67_vm6 = vcmp.lt.s32.totalorder %v30_v17, %v666_v11  ;;  %v904_v25 = vand.u32 4294901760, %v232_v7 }
  0x1e   :  { %v228_v24 = vsub.f32 %v226_v63, %v888_v18  ;;  %206 = vmatpush.msra.mxu1 %v205_v62  ;;  %305 = vmatpush.msra.mxu2 %v220_v57  ;;  %v217_v26 = vand.u32 4294901760, %v216_v6  ;;  %vm906_vm8 = vmand %vm49_vm2, %vm67_vm6  ;;  %v244_v29 = vsub.f32 %v514_v21, %v514_v21  ;;  %v223_v32 = vand.u32 4294901760, %v222_v19 }
  0x1f   :  { %vm48_vm12 = vcmp.ge.s32.totalorder %v29_v23, %v658_v4  ;;  %vm66_vm11 = vcmp.lt.s32.totalorder %v29_v23, %v666_v11  ;;  %535 = vmatpush.msk.msra.mxu0 %vm838_vm14, %v640_v14  ;;  %551 = vmatpush.msk.msra.mxu3 %vm838_vm14, %v640_v14  ;;  %v234_v36 = vsub.f32 %v232_v7, %v904_v25  ;;  %v513_v37 = vsel %vm906_vm8, 1.0, %v641_v16 }
  0x20   :  { %vm918_vm9 = vmand %vm48_vm12, %vm66_vm11  ;;  %v28_v38 = vadd.s32 8, %v655_v1  ;;  %212 = vmatpush.msra.mxu1 %v211_v12  ;;  %308 = vmatpush.msra.mxu2 %v226_v63  ;;  %v250_v41 = vsub.f32 %v513_v37, %v513_v37  ;;  %v927_v42 = vand.u32 4294901760, %v238_v20  ;;  %v229_v46 = vand.u32 4294901760, %v228_v24  ;;  %v25_v24 = vld [vmem:[#allocation2 + $0x8] sm:$0xff] }
  0x21   :  { %v512_v43 = vsel %vm918_vm9, 1.0, %v641_v16  ;;  %536 = vmatpush.msk.msra.mxu0 %vm860_vm7, %v640_v14  ;;  %552 = vmatpush.msk.msra.mxu3 %vm860_vm7, %v640_v14  ;;  %vm64_vm11 = vcmp.lt.s32.totalorder %v655_v1, %v666_v11  ;;  %v949_v53 = vand.u32 4294901760, %v244_v29  ;;  %v235_v55 = vand.u32 4294901760, %v234_v36 }
  0x22   :  { %vm47_vm2 = vcmp.ge.s32.totalorder %v28_v38, %v658_v4  ;;  %vm65_vm6 = vcmp.lt.s32.totalorder %v28_v38, %v666_v11  ;;  %v256_v47 = vsub.f32 %v512_v43, %v512_v43  ;;  %218 = vmatpush.msra.mxu1 %v217_v26  ;;  %311 = vmatpush.msra.mxu2 %v232_v7  ;;  %v951_v54 = vand.u32 4294901760, %v250_v41 }
  0x23   :  { %vm942_vm12 = vmand %vm47_vm2, %vm65_vm6  ;;  %v240_v52 = vsub.f32 %v238_v20, %v927_v42  ;;  %537 = vmatpush.msk.msra.mxu0 %vm872_vm13, %v640_v14  ;;  %553 = vmatpush.msk.msra.mxu3 %vm872_vm13, %v640_v14  ;;  %vm1194_vm2 = vcmp.ge.s32.totalorder %v655_v1, %v658_v4  ;;  %v246_v57 = vsub.f32 %v244_v29, %v949_v53  ;;  %v972_v62 = vand.u32 4294901760, %v24_v48 }
  0x24   :  { %vm962_vm6 = vmand %vm1194_vm2, %vm64_vm11  ;;  %v511_v11 = vsel %vm942_vm12, 1.0, %v641_v16  ;;  %224 = vmatpush.msra.mxu1 %v223_v32  ;;  %314 = vmatpush.msra.mxu2 %v238_v20  ;;  %v970_v61 = vand.u32 4294901760, %v256_v47  ;;  %v252_v63 = vsub.f32 %v250_v41, %v951_v54  ;;  %v1025_v32 = vand.u32 4294901760, %v25_v24 }
  0x25   :  { %v262_v58 = vsub.f32 %v511_v11, %v511_v11  ;;  %538 = vmatpush.msk.msra.mxu0 %vm906_vm8, %v640_v14  ;;  %554 = vmatpush.msk.msra.mxu3 %vm906_vm8, %v640_v14  ;;  %v510_v1 = vsel %vm962_vm6, 1.0, %v641_v16  ;;  %v241_v4 = vand.u32 4294901760, %v240_v52  ;;  %v247_v6 = vand.u32 4294901760, %v246_v57 }
  0x26   :  { %230 = vmatpush.msra.mxu1 %v229_v46  ;;  %317 = vmatpush.msra.mxu2 %v244_v29  ;;  %v268_v2 = vsub.f32 %v510_v1, %v510_v1  ;;  %v258_v16 = vsub.f32 %v256_v47, %v970_v61  ;;  %v996_v10 = vsub.f32 %v24_v48, %v972_v62  ;;  %v253_v12 = vand.u32 4294901760, %v252_v63 }
  0x27   :  { %v984_v5 = vand.u32 4294901760, %v262_v58  ;;  %539 = vmatpush.msk.msra.mxu0 %vm918_vm9, %v640_v14  ;;  %555 = vmatpush.msk.msra.mxu3 %vm918_vm9, %v640_v14 }
  0x28   :  { %236 = vmatpush.msra.mxu1 %v235_v55  ;;  %320 = vmatpush.msra.mxu2 %v250_v41  ;;  %v993_v7 = vand.u32 4294901760, %v268_v2  ;;  %v259_v19 = vand.u32 4294901760, %v258_v16  ;;  %v162_v21 = vand.u32 4294901760, %v996_v10 }
  0x29   :  { %540 = vmatpush.msk.msra.mxu0 %vm942_vm12, %v640_v14  ;;  %556 = vmatpush.msk.msra.mxu3 %vm942_vm12, %v640_v14  ;;  %v264_v17 = vsub.f32 %v262_v58, %v984_v5 }
  0x2a   :  { %242 = vmatpush.msra.mxu1 %v241_v4  ;;  %323 = vmatpush.msra.mxu2 %v256_v47  ;;  %v270_v20 = vsub.f32 %v268_v2, %v993_v7  ;;  %v163_v29 = vsub.f32 %v996_v10, %v162_v21 }
  0x2b   :  { %541 = vmatpush.msk.msra.mxu0 %vm962_vm6, %v640_v14  ;;  %557 = vmatpush.msk.msra.mxu3 %vm962_vm6, %v640_v14  ;;  %v265_v23 = vand.u32 4294901760, %v264_v17 }
  0x2c   :  { %248 = vmatpush.msra.mxu1 %v247_v6  ;;  %326 = vmatpush.msra.mxu2 %v262_v58  ;;  %v271_v26 = vand.u32 4294901760, %v270_v20 }
  0x2d   :  { %389 = vmatpush.msrb.mxu0 %v748_v31  ;;  %590 = vmatpush.msk.msrb.mxu3 %vm678_vm10, %v640_v14 }
  0x2e   :  { %254 = vmatpush.msra.mxu1 %v253_v12  ;;  %329 = vmatpush.msra.mxu2 %v268_v2 }
  0x2f   :  { %393 = vmatpush.msrb.mxu0 %v768_v35  ;;  %591 = vmatpush.msk.msrb.mxu3 %vm691_vm15, %v640_v14 }
  0x30   :  { %574 = vmatpush.msrb.mxu2 %v748_v31  ;;  %260 = vmatpush.msra.mxu1 %v259_v19  ;;  %v164_v31 = vand.u32 4294901760, %v163_v29 }
  0x31   :  { %397 = vmatpush.msrb.mxu0 %v783_v40  ;;  %592 = vmatpush.msk.msrb.mxu3 %vm708_vm0, %v640_v14 }
  0x32   :  { %575 = vmatpush.msrb.mxu2 %v768_v35  ;;  %266 = vmatpush.msra.mxu1 %v265_v23  ;;  %v169_v35 = vsub.f32 %v25_v24, %v1025_v32 }
  0x33   :  { %401 = vmatpush.msrb.mxu0 %v803_v45  ;;  %593 = vmatpush.msk.msrb.mxu3 %vm728_vm1, %v640_v14 }
  0x34   :  { %576 = vmatpush.msrb.mxu2 %v783_v40  ;;  %272 = vmatpush.msra.mxu1 %v271_v26  ;;  %v170_v40 = vand.u32 4294901760, %v169_v35 }
  0x35   :  { %405 = vmatpush.msrb.mxu0 %v817_v51  ;;  %594 = vmatpush.msk.msrb.mxu3 %vm744_vm3, %v640_v14 }
  0x36   :  { %577 = vmatpush.msrb.mxu2 %v803_v45  ;;  %558 = vmatpush.msk.msrb.mxu1 %vm678_vm10, %v640_v14  ;;  %v171_v13 = vsub.f32 %v169_v35, %v170_v40  ;;  %vm1197_vm10 = vnez %v1179_v44 }
  0x37   :  { %409 = vmatpush.msrb.mxu0 %v842_v60  ;;  %595 = vmatpush.msk.msrb.mxu3 %vm764_vm4, %v640_v14 }
  0x38   :  { %578 = vmatpush.msrb.mxu2 %v817_v51  ;;  %559 = vmatpush.msk.msrb.mxu1 %vm691_vm15, %v640_v14  ;;  %v172_v15 = vand.u32 4294901760, %v171_v13  ;;  %vm1198_vm15 = vnez %v1181_v50 }
  0x39   :  { %165 = vmatmul.f32.vlgmr.msra.gmra.mxu0 %v164_v31  ;;  %596 = vmatpush.msk.msrb.mxu3 %vm779_vm5, %v640_v14 }
  0x3a   :  { %413 = vmatpush.msrb.mxu0 %v851_v0  ;;  %579 = vmatpush.msrb.mxu2 %v842_v60 }
  0x3b   :  { %560 = vmatpush.msk.msrb.mxu1 %vm708_vm0, %v640_v14  ;;  %332 = vmatmul.f32.vlgmr.msra.gmra.mxu2 %v996_v10  ;;  %vm502_vm0 = vcmask 64512  }
  0x3c   :  { %417 = vmatpush.msrb.mxu0 %v876_v9  ;;  %580 = vmatpush.msrb.mxu2 %v851_v0 }
  0x3d   :  { %561 = vmatpush.msk.msrb.mxu1 %vm728_vm1, %v640_v14  ;;  %597 = vmatpush.msk.msrb.mxu3 %vm1197_vm10, %v640_v14 }
  0x3e   :  { %421 = vmatpush.msrb.mxu0 %v888_v18  ;;  %581 = vmatpush.msrb.mxu2 %v876_v9 }
  0x3f   :  { %562 = vmatpush.msk.msrb.mxu1 %vm744_vm3, %v640_v14  ;;  %376 = vmatmul.f32.vlgmr.msra.gmra.mxu3 %v162_v21 }
  0x40   :  { %425 = vmatpush.msrb.mxu0 %v904_v25  ;;  %582 = vmatpush.msrb.mxu2 %v888_v18 }
  0x41   :  { %563 = vmatpush.msk.msrb.mxu1 %vm764_vm4, %v640_v14  ;;  %598 = vmatpush.msk.msrb.mxu3 %vm1198_vm15, %v640_v14 }
  0x42   :  { %429 = vmatpush.msrb.mxu0 %v927_v42  ;;  %583 = vmatpush.msrb.mxu2 %v904_v25 }
  0x43   :  { %564 = vmatpush.msk.msrb.mxu1 %vm779_vm5, %v640_v14  ;;  %173 = vmatmul.f32.gmra.mxu0 %v172_v15 }
  0x44   :  { %274 = vmatmul.f32.vlgmr.msra.gmra.mxu1 %v972_v62  ;;  %433 = vmatpush.msrb.mxu0 %v949_v53 }
  0x45   :  { %584 = vmatpush.msrb.mxu2 %v927_v42  ;;  %565 = vmatpush.msk.msrb.mxu1 %vm1197_vm10, %v640_v14 }
  0x46   :  { %599 = vmatpush.msk.msrb.mxu3 %vm838_vm14, %v640_v14  ;;  %437 = vmatpush.msrb.mxu0 %v951_v54 }
  0x47   :  { %585 = vmatpush.msrb.mxu2 %v949_v53  ;;  %566 = vmatpush.msk.msrb.mxu1 %vm1198_vm15, %v640_v14 }
  0x48   :  { %600 = vmatpush.msk.msrb.mxu3 %vm860_vm7, %v640_v14  ;;  %337 = vmatmul.f32.gmra.mxu2 %v169_v35 }
  0x49   :  { %441 = vmatpush.msrb.mxu0 %v970_v61  ;;  %586 = vmatpush.msrb.mxu2 %v951_v54 }
  0x4a   :  { %567 = vmatpush.msk.msrb.mxu1 %vm838_vm14, %v640_v14  ;;  %601 = vmatpush.msk.msrb.mxu3 %vm872_vm13, %v640_v14 }
  0x4b   :  { %382 = vmatmul.f32.gmra.mxu3 %v170_v40  ;;  %445 = vmatpush.msrb.mxu0 %v984_v5 }
  0x4c   :  { %587 = vmatpush.msrb.mxu2 %v970_v61  ;;  %568 = vmatpush.msk.msrb.mxu1 %vm860_vm7, %v640_v14 }
  0x4d   :  { %602 = vmatpush.msk.msrb.mxu3 %vm906_vm8, %v640_v14  ;;  %278 = vmatmul.f32.gmra.mxu1 %v1025_v32 }
  0x4e   :  { %449 = vmatpush.msrb.mxu0 %v993_v7  ;;  %588 = vmatpush.msrb.mxu2 %v984_v5 }
  0x4f   :  { %451 = vmatmul.f32.vlgmr.msrb.gmra.mxu0 %v972_v62  ;;  %569 = vmatpush.msk.msrb.mxu1 %vm872_vm13, %v640_v14 }
  0x50   :  { %603 = vmatpush.msk.msrb.mxu3 %vm918_vm9, %v640_v14  ;;  %589 = vmatpush.msrb.mxu2 %v993_v7 }
  0x51   :  { %570 = vmatpush.msk.msrb.mxu1 %vm906_vm8, %v640_v14  ;;  %455 = vmatmul.f32.vlgmr.msrb.gmra.mxu2 %v1025_v32 }
  0x52   :  { %604 = vmatpush.msk.msrb.mxu3 %vm942_vm12, %v640_v14 }
  0x53   :  { %571 = vmatpush.msk.msrb.mxu1 %vm918_vm9, %v640_v14 }
  0x54   :  { %605 = vmatpush.msk.msrb.mxu3 %vm962_vm6, %v640_v14 }
  0x55   :  { %496 = vmatmul.f32.vlgmr.msrb.gmra.mxu3 %v1025_v32  ;;  %572 = vmatpush.msk.msrb.mxu1 %vm942_vm12, %v640_v14 }
  0x57   :  { %573 = vmatpush.msk.msrb.mxu1 %vm962_vm6, %v640_v14 }
  0x58   :  { %492 = vmatmul.f32.vlgmr.msrb.gmra.mxu1 %v972_v62 }
  0xb6   :  { %v166_v22 = vpop.f32.mrf.mxu0 }
  0xbe   :  { %v333_v30 = vpop.f32.mrf.mxu2 }
  0xc0   :  { %v174_v39 = vpop.f32.mrf.mxu0 }
  0xc1   :  { %v275_v27 = vpop.f32.mrf.mxu1 }
  0xc2   :  { %v377_v34 = vpop.f32.mrf.mxu3  ;;  %v276_v44 = vadd.f32 %v275_v27, %v166_v22 }
  0xc4   :  { %v334_v59 = vadd.f32 %v333_v30, %v276_v44 }
  0xc6   :  { %v378_v8 = vadd.f32 %v377_v34, %v334_v59 }
  0xca   :  { %v279_v45 = vpop.f32.mrf.mxu1 }
  0xcb   :  { %v280_v50 = vadd.f32 %v279_v45, %v174_v39  ;;  %v338_v51 = vpop.f32.mrf.mxu2 }
  0xcc   :  { %v452_v3 = vpop.f32.mrf.mxu0 }
  0xcd   :  { %v339_v0 = vadd.f32 %v338_v51, %v280_v50  ;;  %v453_v18 = vadd.f32 %v452_v3, %v378_v8 }
  0xce   :  { %v383_v60 = vpop.f32.mrf.mxu3 }
  0xcf   :  { %v384_v9 = vadd.f32 %v383_v60, %v339_v0 }
  0xd4   :  { %v456_v25 = vpop.f32.mrf.mxu2 }
  0xd5   :  { %v457_v14 = vadd.f32 %v456_v25, %v384_v9  ;;  %v493_v28 = vpop.f32.mrf.mxu1 }
  0xd6   :  { %v494_v33 = vadd.f32 %v493_v28, %v453_v18 }
  0xd8   :  { %v500_v36 = vmul.f32 0.0625, %v494_v33  ;;  %v497_v37 = vpop.f32.mrf.mxu3 }
  0xd9   :  { %v498_v38 = vadd.f32 %v497_v37, %v457_v14 }
  0xda   :  { %503 = vst.msk [vmem:[%s1159_s1] sm:$0xff] %vm502_vm0, %v500_v36 }
  0xdb   :  { %v501_v41 = vmul.f32 0.0625, %v498_v38 }
  0xdd   :  { %504 = vst.msk [vmem:[%s1159_s1 + $0x8] sm:$0xff] %vm502_vm0, %v501_v41 }
  0xde   :  { %509 = vsyncpa [#allocation3], 1 }

</bundles_post_ra>
